<compile_context>
chip_gen: v5e
topology: v5e:2x2
jax: 0.10.0
libtpu: 0.0.40
codegen_flags: <defaults>
</compile_context>

<pallas_src>
import functools

import jax
import jax.numpy as jnp
from jax.experimental import pallas as pl
from jax.experimental.pallas import tpu as pltpu


def _srl_kernel(pred_ref, tgt_ref, num_ref, cnt_ref, *, norm, ignore_value):
    """Per-(sequence-step, batch) partial sums for SpatialRegressionLoss.

    pred_ref / tgt_ref : (1, 1, C, H*W) block for grid point (s, b).
    num_ref / cnt_ref  : (1, 1, 8, 128) output blocks (scalar broadcast).
    """
    # Cast on load (no-op for f32 inputs; halves HBM traffic if inputs are bf16).
    pred = pred_ref[...].astype(jnp.float32)          # (1, 1, C, HW)
    tgt = tgt_ref[...].astype(jnp.float32)

    diff = pred - tgt
    if norm == 1:
        el = jnp.abs(diff)
    else:
        el = diff * diff

    # mask = target[:, :, :1] != ignore_index  (channel 0 only), broadcast over C.
    mask = tgt[:, :, 0:1, :] != ignore_value          # (1, 1, 1, HW) bool
    el = jnp.where(mask, el, 0.0)                     # vselect, no mask-arith blend

    num = jnp.sum(el)                                 # numerator partial for (s, b)
    cnt = jnp.sum(mask.astype(jnp.float32))           # masked-position count

    num_ref[...] = jnp.full((1, 1, 8, 128), num, dtype=jnp.float32)
    cnt_ref[...] = jnp.full((1, 1, 8, 128), cnt, dtype=jnp.float32)


def spatial_regression_loss(prediction, target, *, norm=2, ignore_index=255,
                            future_discount=1.0, n_present=3):
    """Pallas implementation of SpatialRegressionLoss.forward. Returns scalar f32."""
    assert prediction.ndim == 5, "Must be a 5D tensor"
    assert prediction.shape == target.shape
    B, S, C, H, W = prediction.shape
    assert S >= n_present
    HW = H * W

    # Free reshapes (contiguous); no padding or up-cast copies in HBM.
    pred4 = prediction.reshape(B, S, C, HW)
    tgt4 = target.reshape(B, S, C, HW)

    kernel = functools.partial(
        _srl_kernel, norm=int(norm), ignore_value=float(ignore_index))

    num_part, cnt_part = pl.pallas_call(
        kernel,
        out_shape=(
            jax.ShapeDtypeStruct((S, B, 8, 128), jnp.float32),
            jax.ShapeDtypeStruct((S, B, 8, 128), jnp.float32),
        ),
        grid_spec=pltpu.PrefetchScalarGridSpec(
            num_scalar_prefetch=0,
            grid=(S, B),
            in_specs=[
                pl.BlockSpec((1, 1, C, HW), lambda s, b: (b, s, 0, 0)),
                pl.BlockSpec((1, 1, C, HW), lambda s, b: (b, s, 0, 0)),
            ],
            out_specs=[
                pl.BlockSpec((1, 1, 8, 128), lambda s, b: (s, b, 0, 0)),
                pl.BlockSpec((1, 1, 8, 128), lambda s, b: (s, b, 0, 0)),
            ],
        ),
        compiler_params=pltpu.CompilerParams(
            dimension_semantics=("parallel", "parallel"),
        ),
    )(pred4, tgt4)

    per_s_num = jnp.sum(num_part[:, :, 0, 0], axis=1)      # (S,)
    total_cnt = jnp.sum(cnt_part[:, :, 0, 0])               # scalar

    # Future discounts: [1]*n_present ++ fd**[1..future_len]
    future_len = S - n_present
    discounts = jnp.concatenate([
        jnp.ones((n_present,), jnp.float32),
        jnp.float32(future_discount)
        ** jnp.arange(1, future_len + 1, dtype=jnp.float32),
    ])

    total_num = jnp.sum(per_s_num * discounts)
    # Mirrors `if mask.sum() == 0: return 0.` (no data-dependent early exit on TPU).
    return jnp.where(total_cnt > 0,
                     total_num / jnp.maximum(total_cnt, 1.0),
                     jnp.float32(0.0))


def _reference(prediction, target, *, norm, ignore_index, future_discount, n_present):
    """Pure-JAX reference mirroring the PyTorch forward."""
    mask = target[:, :, :1] != ignore_index
    if norm == 1:
        el = jnp.abs(prediction - target)
    else:
        el = (prediction - target) ** 2
    loss = jnp.sum(el, axis=-3, keepdims=True)
    S = loss.shape[1]
    future_len = S - n_present
    discounts = jnp.concatenate([
        jnp.ones((n_present,), jnp.float32),
        jnp.float32(future_discount)
        ** jnp.arange(1, future_len + 1, dtype=jnp.float32),
    ]).reshape(1, S, 1, 1, 1)
    loss = loss * discounts
    cnt = jnp.sum(mask).astype(jnp.float32)
    return jnp.where(cnt > 0,
                     jnp.sum(jnp.where(mask, loss, 0.0)) / jnp.maximum(cnt, 1.0),
                     jnp.float32(0.0))


if __name__ == "__main__":
    key = jax.random.PRNGKey(0)
    k1, k2 = jax.random.split(key)

    B, S, C, H, W = 2, 5, 3, 16, 16          # 5D (batch, seq, channel, H, W)
    n_present = 3
    future_discount = 0.95
    ignore_index = 255

    prediction = jax.random.normal(k1, (B, S, C, H, W), jnp.float32)
    target = jax.random.normal(k2, (B, S, C, H, W), jnp.float32)
    # Mark a band of pixels as "ignore" (all channels = ignore_index), so the
    # channel-0 mask path is exercised.
    target = target.at[:, :, :, :4, :].set(float(ignore_index))

    for norm in (2, 1):
        loss = spatial_regression_loss(
            prediction, target, norm=norm, ignore_index=ignore_index,
            future_discount=future_discount, n_present=n_present)
        loss = jax.block_until_ready(loss)
        ref = _reference(
            prediction, target, norm=norm, ignore_index=ignore_index,
            future_discount=future_discount, n_present=n_present)
        assert jnp.allclose(loss, ref, rtol=1e-5, atol=1e-5), (norm, loss, ref)

    # All-ignored path must return 0 (mirrors `if mask.sum() == 0` early return).
    all_ignored = jnp.full((B, S, C, H, W), float(ignore_index), jnp.float32)
    zero_loss = spatial_regression_loss(
        prediction, all_ignored, norm=2, ignore_index=ignore_index,
        future_discount=future_discount, n_present=n_present)
    zero_loss = jax.block_until_ready(zero_loss)
    assert jnp.allclose(zero_loss, 0.0), zero_loss

    print("KERNEL_OK")
</pallas_src>

<mosaic_0001>
module attributes {stable_mosaic.version = 11 : i64} {
  func.func @_srl_kernel(%arg0: i32, %arg1: i32, %arg2: memref<1x1x3x256xf32, #tpu.memory_space<vmem>>, %arg3: memref<1x1x3x256xf32, #tpu.memory_space<vmem>>, %arg4: memref<1x1x8x128xf32, #tpu.memory_space<vmem>>, %arg5: memref<1x1x8x128xf32, #tpu.memory_space<vmem>>) attributes {dimension_semantics = [#tpu.dimension_semantics<parallel>, #tpu.dimension_semantics<parallel>], iteration_bounds = array<i64: 5, 2>, scalar_prefetch = 0 : i64, scratch_operands = 0 : i64, tpu.core_type = #tpu.core_type<tc>, window_params = [{transform_indices = @transform_0, window_bounds = array<i64: 1, 1, 3, 256>}, {transform_indices = @transform_1, window_bounds = array<i64: 1, 1, 3, 256>}, {transform_indices = @transform_2, window_bounds = array<i64: 1, 1, 8, 128>}, {transform_indices = @transform_3, window_bounds = array<i64: 1, 1, 8, 128>}]} {
    %c0 = arith.constant 0 : index
    %c0_0 = arith.constant 0 : index
    %c0_1 = arith.constant 0 : index
    %c0_2 = arith.constant 0 : index
    %0 = vector.load %arg2[%c0, %c0_0, %c0_1, %c0_2] : memref<1x1x3x256xf32, #tpu.memory_space<vmem>>, vector<1x1x3x256xf32>
    %c0_3 = arith.constant 0 : index
    %c0_4 = arith.constant 0 : index
    %c0_5 = arith.constant 0 : index
    %c0_6 = arith.constant 0 : index
    %1 = vector.load %arg3[%c0_3, %c0_4, %c0_5, %c0_6] : memref<1x1x3x256xf32, #tpu.memory_space<vmem>>, vector<1x1x3x256xf32>
    %2 = arith.subf %0, %1 : vector<1x1x3x256xf32>
    %3 = arith.mulf %2, %2 : vector<1x1x3x256xf32>
    %4 = vector.extract_strided_slice %1 {offsets = [0, 0, 0, 0], sizes = [1, 1, 1, 256], strides = [1, 1, 1, 1]} : vector<1x1x3x256xf32> to vector<1x1x1x256xf32>
    %cst = arith.constant 2.550000e+02 : f32
    %5 = vector.broadcast %cst : f32 to vector<1x1x1x256xf32>
    %6 = arith.cmpf one, %4, %5 : vector<1x1x1x256xf32>
    %cst_7 = arith.constant 0.000000e+00 : f32
    %7 = vector.shape_cast %6 : vector<1x1x1x256xi1> to vector<1x1x1x256xi1>
    %8 = vector.broadcast %7 : vector<1x1x1x256xi1> to vector<1x1x3x256xi1>
    %9 = vector.broadcast %cst_7 : f32 to vector<1x1x3x256xf32>
    %10 = arith.select %8, %3, %9 : vector<1x1x3x256xi1>, vector<1x1x3x256xf32>
    %11 = vector.shape_cast %10 : vector<1x1x3x256xf32> to vector<1x1x1x3x256xf32>
    %cst_8 = arith.constant dense<0.000000e+00> : vector<1xf32>
    %12 = vector.multi_reduction <add>, %11, %cst_8 [1, 2, 3, 4] : vector<1x1x1x3x256xf32> to vector<1xf32>
    %13 = vector.shape_cast %12 : vector<1xf32> to vector<1x1x1x1x1xf32>
    %14 = vector.extract %13[0, 0, 0, 0, 0] : f32 from vector<1x1x1x1x1xf32>
    %15 = arith.extui %6 : vector<1x1x1x256xi1> to vector<1x1x1x256xi32>
    %16 = arith.sitofp %15 : vector<1x1x1x256xi32> to vector<1x1x1x256xf32>
    %17 = vector.shape_cast %16 : vector<1x1x1x256xf32> to vector<1x1x1x1x256xf32>
    %cst_9 = arith.constant dense<0.000000e+00> : vector<1xf32>
    %18 = vector.multi_reduction <add>, %17, %cst_9 [1, 2, 3, 4] : vector<1x1x1x1x256xf32> to vector<1xf32>
    %19 = vector.shape_cast %18 : vector<1xf32> to vector<1x1x1x1x1xf32>
    %20 = vector.extract %19[0, 0, 0, 0, 0] : f32 from vector<1x1x1x1x1xf32>
    %21 = vector.broadcast %14 : f32 to vector<1x1x8x128xf32>
    %c0_10 = arith.constant 0 : index
    %c0_11 = arith.constant 0 : index
    %c0_12 = arith.constant 0 : index
    %c0_13 = arith.constant 0 : index
    %22 = vector.load %arg4[%c0_10, %c0_11, %c0_12, %c0_13] : memref<1x1x8x128xf32, #tpu.memory_space<vmem>>, vector<1x1x8x128xf32>
    tpu.vector_store %arg4[%c0_10, %c0_11, %c0_12, %c0_13], %21 {strides = array<i32>} : memref<1x1x8x128xf32, #tpu.memory_space<vmem>>, vector<1x1x8x128xf32>,
    %23 = vector.broadcast %20 : f32 to vector<1x1x8x128xf32>
    %c0_14 = arith.constant 0 : index
    %c0_15 = arith.constant 0 : index
    %c0_16 = arith.constant 0 : index
    %c0_17 = arith.constant 0 : index
    %24 = vector.load %arg5[%c0_14, %c0_15, %c0_16, %c0_17] : memref<1x1x8x128xf32, #tpu.memory_space<vmem>>, vector<1x1x8x128xf32>
    tpu.vector_store %arg5[%c0_14, %c0_15, %c0_16, %c0_17], %23 {strides = array<i32>} : memref<1x1x8x128xf32, #tpu.memory_space<vmem>>, vector<1x1x8x128xf32>,
    return
  }
  func.func @transform_0(%arg0: i32, %arg1: i32) -> (i32, i32, i32, i32) {
    %c0_i32 = arith.constant 0 : i32
    %c0_i32_0 = arith.constant 0 : i32
    %c0_i32_1 = arith.constant 0 : i32
    return %arg1, %arg0, %c0_i32, %c0_i32_0 : i32, i32, i32, i32
  }
  func.func @transform_1(%arg0: i32, %arg1: i32) -> (i32, i32, i32, i32) {
    %c0_i32 = arith.constant 0 : i32
    %c0_i32_0 = arith.constant 0 : i32
    %c0_i32_1 = arith.constant 0 : i32
    return %arg1, %arg0, %c0_i32, %c0_i32_0 : i32, i32, i32, i32
  }
  func.func @transform_2(%arg0: i32, %arg1: i32) -> (i32, i32, i32, i32) {
    %c0_i32 = arith.constant 0 : i32
    %c0_i32_0 = arith.constant 0 : i32
    %c0_i32_1 = arith.constant 0 : i32
    return %arg0, %arg1, %c0_i32, %c0_i32_0 : i32, i32, i32, i32
  }
  func.func @transform_3(%arg0: i32, %arg1: i32) -> (i32, i32, i32, i32) {
    %c0_i32 = arith.constant 0 : i32
    %c0_i32_0 = arith.constant 0 : i32
    %c0_i32_1 = arith.constant 0 : i32
    return %arg0, %arg1, %c0_i32, %c0_i32_0 : i32, i32, i32, i32
  }
}

</mosaic_0001>

<bundles_post_ra>
// kernel: tpu_custom_call.1
= control target key start
LH: loop header
LB: loop body
LE: loop exit
PB: predicated region body
PF: predicated region fallthrough
CT: control target
= control target key end

     0   :  { %s872_s0 = inlined_call_operand.vmem [shape: f32[2,5,3,256], index: 0, kind: input, shape index: {}]   ;;  %s873_s1 = inlined_call_operand.vmem [shape: f32[2,5,3,256], index: 1, kind: input, shape index: {}]   ;;  %s874_s2 = inlined_call_operand.hbm [shape: f32[5,2,8,128], index: 2, kind: output, shape index: {0}]   ;;  %s875_s3 = inlined_call_operand.hbm [shape: f32[5,2,8,128], index: 3, kind: output, shape index: {1}]  }
   0x1   :  { %876 = sst [smem:[#allocation8_spill]] %s872_s0 }
   0x2   :  { %877 = sst [smem:[#allocation9_spill]] %s873_s1 }
   0x3   :  { %9 = vsyncpa [#allocation3], 0 }
   0x4   :  { %11 = vsyncpa [#allocation3 + $0x1], 0 }
   0x5   :  { %12 = vsyncpa [#allocation5], 0 }
   0x6   :  { %14 = vsyncpa [#allocation5 + $0x1], 0  ;;  %s729_s12 = smov 0   ;;  %s731_s13 = smov 0  }
   0x7   :  { %s733_s14 = smov 0   ;;  %s735_s15 = smov 0  }
   0x8   :  { %s737_s16 = smov 0   ;;  %s739_s17 = smov 0  }
   0x9   :  { %s741_s18 = smov 0   ;;  %s743_s19 = smov 0  }
   0xa LB: > { %s476_s20 = sadd.s32 4294967295, %s705_s19   ;;  %s477_s21 = sadd.s32 4294967294, %s705_s19   ;;  %s705_s19 = sphi %s743_s19, %s20_s19   ;;  %s701_s18 = sphi %s741_s18, %s888_s18   ;;  %s697_s17 = sphi %s739_s17, %s887_s17   ;;  %s693_s16 = sphi %s737_s16, %s886_s16   ;;  %s689_s15 = sphi %s735_s15, %s885_s15   ;;  %s685_s14 = sphi %s733_s14, %s884_s14   ;;  %s681_s13 = sphi %s731_s13, %s883_s13   ;;  %s677_s12 = sphi %s729_s12, %s882_s12  }
   0xb   : > { %s29_s22 = sadd.s32 1, %s697_s17  ;;  %s32_s23 = sadd.s32 1, %s701_s18 }
   0xc   : > { %p30_p0 = scmp.ge.s32.totalorder %s29_s22, 2  ;;  %p107_p1 = scmp.ne.s32.totalorder %s685_s14, %s681_s13 }
   0xd   : > { %p108_p2 = scmp.eq.s32.totalorder %s476_s20, 9  ;;  %p113_p5 = scmp.ne.s32.totalorder %s681_s13, %s677_s12 }
   0xe   : > { %s890_s22 = smov (%p30_p0, %s29_s22), 0  ;;  %s892_s23 = smov (!%p30_p0, %s32_s23), %s701_s18 }
   0xf   : > { %s93_s24 = ssub.s32 %s697_s17, %s890_s22  ;;  %p780_p3 = por %p108_p2, %p107_p1 }
  0x10   : > { %p34_p4 = scmp.ge.s32.totalorder %s892_s23, 5  ;;  %p114_p6 = scmp.eq.s32.totalorder %s477_s21, 9 }
  0x11   : > { %p480_p7 = scmp.ge.s32.totalorder %s705_s19, 1  ;;  %p184_p9 = scmp.lt.s32.totalorder %s705_s19, 11 }
  0x12   : > { %s894_s23 = smov (%p34_p4, %s892_s23), 0  ;;  %p789_p8 = por %p114_p6, %p113_p5 }
  0x13   : > { %s92_s27 = ssub.s32 %s701_s18, %s894_s23  ;;  %s97_s28 = sadd.s32 1, %s685_s14 }
  0x14   : > { %s94_s29 = sor.u32 %s93_s24, %s92_s27  ;;  %p185_p10 = pnand %p480_p7, %p184_p9 }
  0x15   : > { %p95_p11 = scmp.eq.s32.totalorder %s94_s29, 0  ;;  %p226_p12 = scmp.lt.s32.totalorder (!%p185_p10), %s689_s15, 1 }
  0x16   : > { %188 = sbr.rel (%p185_p10) target bundleno = 248 (0xf8), region = 28  ;;  %p228_p13 = scmp.lt.s32.totalorder (!%p185_p10), %s693_s16, 4 }
  0x17   : > { %s798_s30 = scalar_select %p95_p11, %s685_s14, %s97_s28  }
  0x18   : > { %s880_s0 = sld [smem:[#allocation8_spill]] (!%p185_p10)  ;;  %s490_s28 = sshll.u32 (!%p185_p10), %s693_s16, 1 }
  0x19   : > { %s881_s1 = sld [smem:[#allocation9_spill]] (!%p185_p10)  ;;  %s316_s29 = sadd.s32 (!%p185_p10), %s689_s15, %s490_s28 }
  0x1b   : > { %s227_s4 = scalar_select %p226_p12, %s689_s15, 1  ;;  %v707_v3 = vmov 0   ;;  %vm264_vm3 = vcmask 1042432   ;;  %v708_v10 = vmov 0.0   ;;  %vm283_vm4 = vcmask 1040384  }
  0x1c   : > { %s229_s5 = scalar_select %p228_p13, %s693_s16, 4 }
  0x1d   : > { %s496_s6 = smul.u32 10, %s227_s4  ;;  %s813_s4 = sand.u32 1, %s681_s13  }
  0x1e   : > { %s483_s7 = sshll.u32 %s229_s5, 1  ;;  %s491_s5 = sshll.u32 %s316_s29, 3 }
  0x1f   : > { %s232_s8 = sadd.s32 %s496_s6, %s483_s7  ;;  %s481_s6 = sshll.u32 %s813_s4, 3 }
  0x20   : > { %s484_s9 = sshll.u32 %s232_s8, 2  ;;  %s218_s10 = scalar_lea.vmem [#allocation2], %s481_s6 }
  0x21   : > { %s234_s20 = scalar_lea.vmem %s880_s0, %s484_s9  ;;  %s243_s27 = scalar_lea.vmem %s881_s1, %s484_s9 }
  0x22   : > { %v244_v0 = vld [vmem:[%s234_s20] sm:$0x77]  ;;  %s318_s9 = scalar_lea.hbm %s874_s2, %s491_s5  ;;  %s320_s11 = sshll.u32 %s218_s10, 4  ;;  %s321_s11 = int_to_ptr.vmem [resolvable:$true] %s320_s11 }
  0x23   : > { %v245_v1 = vld [vmem:[%s243_s27] sm:$0x77]  ;;  %s322_s20 = sshll.u32 %s318_s9, 4  ;;  %s334_s24 = scalar_lea.hbm %s875_s3, %s491_s5  ;;  %s323_s20 = int_to_ptr.hbm [resolvable:$true] %s322_s20 }
  0x24   : > { %v246_v2 = vsub.f32 %v244_v0, %v245_v1  ;;  %vm248_vm0 = vcmp.ne.f32.partialorder %v245_v1, 255.0  ;;  %s301_s27 = scalar_lea.sflag [#allocation3], %s813_s4  ;;  %s593_s28 = sshra.s32 %s323_s20, 4  ;;  %s594_s28 = int_to_ptr.hbm [resolvable:$true] %s593_s28 }
  0x25   : > { %v249_v4 = vsel %vm248_vm0, 1, %v707_v3  ;;  %v487_v11 = vsel %vm248_vm0, 1.0, %v708_v10  ;;  %s595_s29 = scalar_lea.hbm %s594_s28, 8  ;;  %s599_s9 = scalar_lea.hbm %s874_s2, 80 }
  0x26   : > { %v247_v5 = vmul.f32 %v246_v2, %v246_v2  ;;  %v250_v6 = vperm.slane %v249_v4, 0  ;;  %v251_v7 = vperm.slane %v249_v4, 4  ;;  %v279_v18 = vperm.slane %v487_v11, 0  ;;  %p596_p0 = scmp.ne.s32.totalorder %s594_s28, %s595_s29  ;;  %p600_p4 = scmp.lt.s32.totalorder %s594_s28, %s874_s2 }
  0x27   : > { %v280_v19 = vperm.slane %v487_v11, 4  ;;  %p601_p5 = scmp.lt.s32.totalorder %s599_s9, %s595_s29 }
  0x28   : > { %257 = vst [vmem:[#allocation1] ss:$2 sm:$0xff] %v247_v5  ;;  %v252_v8 = vperm.slane %v250_v6, 0  ;;  %v253_v9 = vperm.slane %v251_v7, 0  ;;  %v284_v21 = vsel %vm283_vm4, %v279_v18, 0.0  ;;  %p597_p1 = pnand %p596_p0, %p780_p3 }
  0x29   : > { %v285_v22 = vsel %vm283_vm4, %v280_v19, 0.0  ;;  %p602_p6 = por %p601_p5, %p600_p4 }
  0x2a   : > { %vm254_vm1 = vcmp.eq.s32.totalorder %v252_v8, 1  ;;  %vm255_vm2 = vcmp.eq.s32.totalorder %v253_v9, 1  ;;  %v286_v23 = vadd.f32 %v285_v22, %v284_v21  ;;  %p598_p2 = pneg %p597_p1 }
  0x2c   : > { %p603_p7 = pnand %p602_p6, %p598_p2 }
  0x2f   : > { %v258_v12 = vld.sshfl [vmem:[#allocation1] sm:$0xff pattern:$0x75316420]  ;;  %v259_v13 = vld.sshfl [vmem:[#allocation1 + $0x8] sm:$0xff pattern:$0x75316420] }
  0x30   : > { %v262_v14 = vsel %vm254_vm1, %v258_v12, 0.0  ;;  %v263_v15 = vsel %vm255_vm2, %v259_v13, 0.0 }
  0x31   : > { %v265_v16 = vsel %vm264_vm3, %v262_v14, 0.0  ;;  %v266_v17 = vsel %vm264_vm3, %v263_v15, 0.0 }
  0x32   : > { %v267_v20 = vadd.f32 %v266_v17, %v265_v16 }
  0x34   : > { %268 = vadd.xlane.f32.xlu0 %v267_v20 }
  0x3c   : > { %287 = vadd.xlane.f32.xlu0 %v286_v23 }
  0xa7   : > { %v269_v24 = vpop.xlane.xlu0 %268 }
  0xa8   : > { %v270_v25 = vrot.slane %v269_v24, 4 }
  0xaa   : > { %v271_v26 = vadd.f32 %v270_v25, %v269_v24 }
  0xac   : > { %v272_v27 = vrot.slane %v271_v26, 2 }
  0xae   : > { %v273_v28 = vadd.f32 %v272_v27, %v271_v26 }
  0xaf   : > { %v288_v29 = vpop.xlane.xlu0 %287 }
  0xb0   : > { %v289_v30 = vrot.slane %v288_v29, 4  ;;  %v274_v31 = vrot.slane %v273_v28, 1 }
  0xb2   : > { %v290_v32 = vadd.f32 %v289_v30, %v288_v29  ;;  %v275_v33 = vadd.f32 %v274_v31, %v273_v28 }
  0xb4   : > { %v291_v34 = vrot.slane %v290_v32, 2  ;;  %497 = vpush %v275_v33 }
  0xb6   : > { %v292_v35 = vadd.f32 %v291_v34, %v290_v32 }
  0xb8   : > { %v293_v36 = vrot.slane %v292_v35, 1 }
  0xba   : > { %v294_v37 = vadd.f32 %v293_v36, %v292_v35 }
  0xbc   : > { %499 = vpush %v294_v37 }
  0xe5   : > { %s498_s21 = spop %497 }
  0xe6   : > { %v296_v38 = vstv %s498_s21 }
  0xe7   : > { %297 = vst [vmem:[%s218_s10] sm:$0xff] %v296_v38 }
  0xe8   : > { %606 = shalt.err (!%p603_p7)
}
  0xe9   : > { %501 = dma.vmem_to_hbm [thread:$0]  (%p780_p3), %s321_s11, 128, %s323_s20, %s301_s27  }
  0xea   : > { %s225_s5 = scalar_lea.vmem [#allocation4], %s481_s6  ;;  %s338_s21 = sshll.u32 %s334_s24, 4  ;;  %s339_s21 = int_to_ptr.hbm [resolvable:$true] %s338_s21 }
  0xeb   : > { %s336_s10 = sshll.u32 %s225_s5, 4  ;;  %s306_s16 = scalar_lea.sflag [#allocation5], %s813_s4  ;;  %s337_s10 = int_to_ptr.vmem [resolvable:$true] %s336_s10 }
  0xec   : > { %s621_s0 = sshra.s32 %s339_s21, 4  ;;  %s627_s11 = scalar_lea.hbm %s875_s3, 80  ;;  %s622_s0 = int_to_ptr.hbm [resolvable:$true] %s621_s0 }
  0xed   : > { %s500_s15 = spop %499  ;;  %s623_s1 = scalar_lea.hbm %s622_s0, 8 }
  0xee   : > { %v298_v39 = vstv %s500_s15  ;;  %p624_p9 = scmp.ne.s32.totalorder %s622_s0, %s623_s1  ;;  %p628_p12 = scmp.lt.s32.totalorder %s622_s0, %s875_s3 }
  0xef   : > { %299 = vst [vmem:[%s225_s5] sm:$0xff] %v298_v39  ;;  %p629_p13 = scmp.lt.s32.totalorder %s627_s11, %s623_s1 }
  0xf0   : > { %p625_p10 = pnand %p624_p9, %p780_p3 }
  0xf1   : > { %p630_p0 = por %p629_p13, %p628_p12 }
  0xf2   : > { %p626_p11 = pneg %p625_p10 }
  0xf4   : > { %p631_p1 = pnand %p630_p0, %p626_p11 }
  0xf6   : > { %634 = shalt.err (!%p631_p1)
}
  0xf7   : > { %502 = dma.vmem_to_hbm [thread:$0]  (%p780_p3), %s337_s10, 128, %s339_s21, %s306_s16  }
  0xf8 PF: > { %p512_p2 = scmp.ge.s32.totalorder %s705_s19, 2  ;;  %s350_s4 = sand.u32 1, %s677_s12  }
  0xf9   : > { %s351_s24 = scalar_lea.sflag [#allocation3], %s350_s4 }
  0xfa   : > { %p506_p4 = pnand %p512_p2, %p789_p8 }
  0xfc   : > { %p507_p5 = pneg %p506_p4 }
  0xfe   : > { %668 = dma.done.wait (%p507_p5), %s351_s24, 128  }
  0xff   : > { %670 = vsyncadd (%p507_p5), %s351_s24, 4294967168  ;;  %s361_s27 = scalar_lea.sflag [#allocation5], %s350_s4 }
 0x100   : > { %672 = dma.done.wait (%p507_p5), %s361_s27, 128  }
 0x101   : > { %674 = vsyncadd (%p507_p5), %s361_s27, 4294967168  ;;  %s20_s19 = sadd.s32 1, %s705_s19   ;;  %s882_s12 = smov %s681_s13 }
 0x102   : > { %p17_p6 = scmp.ge.s32.totalorder %s20_s19, 12   ;;  %s883_s13 = smov %s685_s14 }
 0x103   : > { %s884_s14 = smov %s798_s30  ;;  %s885_s15 = smov %s697_s17 }
 0x104   : > { %s886_s16 = smov %s701_s18  ;;  %s887_s17 = smov %s890_s22 }
 0x105   : > { %s888_s18 = smov %s894_s23  ;;  %19 = sbr.rel (!%p17_p6) target bundleno = 10 (0xa), region = 83 }
 0x10a   :  { %367 = vsyncpa [#allocation3], 1 }
 0x10b   :  { %369 = vsyncpa [#allocation3 + $0x1], 1 }
 0x10c   :  { %370 = vsyncpa [#allocation5], 1 }
 0x10d   :  { %372 = vsyncpa [#allocation5 + $0x1], 1 }

</bundles_post_ra>
